<compile_context>
chip_gen: v5e
topology: v5e:2x2
jax: 0.10.0
libtpu: 0.0.40
codegen_flags: <defaults>
</compile_context>

<pallas_src>
import functools

import jax
import jax.numpy as jnp
from jax.experimental import pallas as pl
from jax.experimental.pallas import tpu as pltpu

FEAT_DIM = 32    # feature_size
MEM_DIM = 32     # memory_dimension
MSG_DIM = 32     # message_dimension
EMB_DIM = 32     # node embedding dim produced by TGNN
HID = 32         # mlp_hidden_dims = [32, 32]
KDIM = 2 * MEM_DIM + MSG_DIM  # 96, true concat width (no pad to 128)
MAX_TILE = 1024  # row/lane tile upper bound (multiple of 8 and of 128)


def _round_up(v, m):
    return (v + m - 1) // m * m


def _tiling(n, granule):
    """Tile size (multiple of `granule`, <= MAX_TILE) and padded extent.

    granule is 8 for sublane-tiled axes and 128 for lane-tiled axes, so every
    BlockSpec below is legal.  When the extent spans more than one granule the
    tile is chosen so the grid has at least 2 steps (v7x megacore sharding).
    """
    full = _round_up(max(n, 1), granule)
    if full <= granule:
        tile = granule
    else:
        tile = min(MAX_TILE, _round_up((full + 1) // 2, granule))
    padded = _round_up(n, tile)
    return tile, padded


# ---------------------------------------------------------------------------
# Kernel 1: per-edge message MLP (tiled over E on the sublane axis).
#   msgs = ReLU([mem_src | mem_dst | edge_attr] @ W_msg + b_msg)   -> bf16
# ---------------------------------------------------------------------------
def edge_msg_kernel(msg_in_ref, w_ref, b_ref, msgs_ref):
    acc = jnp.dot(msg_in_ref[...], w_ref[...],
                  preferred_element_type=jnp.float32)
    msgs_ref[...] = jnp.maximum(acc + b_ref[...], 0.0).astype(msgs_ref.dtype)


# ---------------------------------------------------------------------------
# Kernel 2: per-node MLP in transposed form (tiled over N on the lane axis).
#   h^T = W3^T ReLU(W2^T ReLU(W1^T [x|memory|agg]^T + b1) + b2) + b3 -> bf16
# Output (EMB_DIM, tn) is lane-dense (unmasked stores).
# ---------------------------------------------------------------------------
def node_mlp_kernel(nin_t_ref, w1t_ref, b1_ref, w2t_ref, b2_ref,
                    w3t_ref, b3_ref, ht_ref):
    z = jnp.dot(w1t_ref[...], nin_t_ref[...],
                preferred_element_type=jnp.float32) + b1_ref[...]
    z = jnp.maximum(z, 0.0).astype(jnp.bfloat16)
    z = jnp.dot(w2t_ref[...], z,
                preferred_element_type=jnp.float32) + b2_ref[...]
    z = jnp.maximum(z, 0.0).astype(jnp.bfloat16)
    h = jnp.dot(w3t_ref[...], z,
                preferred_element_type=jnp.float32) + b3_ref[...]
    ht_ref[...] = h.astype(ht_ref.dtype)


# ---------------------------------------------------------------------------
# Kernel 3: link-prediction classifier (tiled over E on the lane axis).
# First Linear(64,32) is split into src/dst halves so no pair concat or
# transpose is needed; Linear(32,1) is a VPU multiply + sublane reduce.
#   z      = ReLU(Wc1a^T h_src^T + Wc1b^T h_dst^T + bc1)        [32, TE]
#   logits = sum_k z[k,:] * wc2[k] + bc2                        [1, TE]
#   out    = sigmoid(logits)                                    lane-dense
# ---------------------------------------------------------------------------
def classifier_kernel(hs_ref, hd_ref, wc1a_ref, wc1b_ref, bc1_ref, wc2_ref,
                      bc2_ref, out_ref):
    z = jnp.dot(wc1a_ref[...], hs_ref[...],
                preferred_element_type=jnp.float32)
    z = z + jnp.dot(wc1b_ref[...], hd_ref[...],
                    preferred_element_type=jnp.float32)
    z = jnp.maximum(z + bc1_ref[...], 0.0)
    logits = jnp.sum(z * wc2_ref[...], axis=0, keepdims=True) + bc2_ref[0]
    out_ref[...] = jax.nn.sigmoid(logits)


# ---------------------------------------------------------------------------
# Parameter initialization (deterministic, in-script).
# ---------------------------------------------------------------------------
def init_params(key):
    def lin(k, fan_in, fan_out):
        k1, k2 = jax.random.split(k)
        w = jax.random.normal(k1, (fan_in, fan_out), jnp.float32) / jnp.sqrt(
            jnp.float32(fan_in))
        b = jax.random.normal(k2, (1, fan_out), jnp.float32) * 0.01
        return w, b

    keys = jax.random.split(key, 6)
    w_msg, b_msg = lin(keys[0], 2 * MEM_DIM + MSG_DIM, MSG_DIM)   # [96,32]
    w1, b1 = lin(keys[1], FEAT_DIM + MEM_DIM + MSG_DIM, HID)      # [96,32]
    w2, b2 = lin(keys[2], HID, HID)                               # [32,32]
    w3, b3 = lin(keys[3], HID, EMB_DIM)                           # [32,32]
    wc1, bc1 = lin(keys[4], 2 * EMB_DIM, HID)                     # [64,32]
    wc2, bc2 = lin(keys[5], HID, 1)                               # [32, 1]
    return dict(w_msg=w_msg, b_msg=b_msg, w1=w1, b1=b1, w2=w2, b2=b2,
                w3=w3, b3=b3, wc1=wc1, bc1=bc1, wc2=wc2, bc2=bc2)


# ---------------------------------------------------------------------------
# Pure-JAX reference (f32) for correctness checking.
# ---------------------------------------------------------------------------
def reference_forward(x, edge_index, edge_attr, memory, params):
    src, dst = edge_index[0], edge_index[1]
    n, e = x.shape[0], edge_index.shape[1]
    msg_in = jnp.concatenate([memory[src], memory[dst], edge_attr], axis=1)
    msgs = jax.nn.relu(msg_in @ params["w_msg"] + params["b_msg"])
    agg_sum = jax.ops.segment_sum(msgs, dst, num_segments=n)
    deg = jax.ops.segment_sum(jnp.ones((e,), jnp.float32), dst, num_segments=n)
    agg = agg_sum / jnp.maximum(deg, 1.0)[:, None]
    node_in = jnp.concatenate([x, memory, agg], axis=1)
    z = jax.nn.relu(node_in @ params["w1"] + params["b1"])
    z = jax.nn.relu(z @ params["w2"] + params["b2"])
    h = z @ params["w3"] + params["b3"]
    pair = jnp.concatenate([h[src], h[dst]], axis=1)
    zc = jax.nn.relu(pair @ params["wc1"] + params["bc1"])
    return jax.nn.sigmoid(zc @ params["wc2"] + params["bc2"])


# ---------------------------------------------------------------------------
# Wrapper: XLA glue (gathers, segment-mean, padding/casts) + three pallas_calls.
# ---------------------------------------------------------------------------
def tgn_link_predictor(x, edge_index, edge_attr, y, memory, params):
    del y  # unused in the PyTorch forward pass
    f32, bf16 = jnp.float32, jnp.bfloat16
    n = x.shape[0]
    e = edge_index.shape[1]
    src = edge_index[0]
    dst = edge_index[1]

    te1, e_pad1 = _tiling(e, 8)      # stage 1: edges on the sublane axis
    tn, n_pad = _tiling(n, 128)      # stage 2: nodes on the lane axis
    te3, e_pad3 = _tiling(e, 128)    # stage 3: edges on the lane axis

    cparams = pltpu.CompilerParams(
        dimension_semantics=("parallel",),
        vmem_limit_bytes=32 * 1024 * 1024)

    # ----- kernel-ready parameters (bf16 MXU operands, f32 biases) ----------
    w_msg = params["w_msg"].astype(bf16)                     # [96,32]
    b_msg = params["b_msg"]                                  # [1,32] f32
    w1_t = params["w1"].T.astype(bf16)                       # [32,96]
    w2_t = params["w2"].T.astype(bf16)                       # [32,32]
    w3_t = params["w3"].T.astype(bf16)                       # [32,32]
    b1_c = params["b1"].reshape(HID, 1)                      # [32,1] f32
    b2_c = params["b2"].reshape(HID, 1)
    b3_c = params["b3"].reshape(EMB_DIM, 1)
    wc1a_t = params["wc1"][:EMB_DIM].T.astype(bf16)          # [32,32]
    wc1b_t = params["wc1"][EMB_DIM:].T.astype(bf16)          # [32,32]
    bc1_c = params["bc1"].reshape(HID, 1)                    # [32,1] f32
    wc2_c = params["wc2"].reshape(HID, 1)                    # [32,1] f32
    bc2_s = params["bc2"].reshape(1)                         # [1]    f32 (SMEM)

    # ----- stage 1: per-edge message MLP (grid over E tiles) -----------------
    mem_src = jnp.take(memory, src, axis=0)
    mem_dst = jnp.take(memory, dst, axis=0)
    msg_in = jnp.concatenate([mem_src, mem_dst, edge_attr], axis=1)    # [E,96]
    msg_in = jnp.pad(msg_in, ((0, e_pad1 - e), (0, 0))).astype(bf16)

    msgs = pl.pallas_call(
        edge_msg_kernel,
        out_shape=jax.ShapeDtypeStruct((e_pad1, MSG_DIM), bf16),
        grid=(e_pad1 // te1,),
        in_specs=[
            pl.BlockSpec((te1, KDIM), lambda i: (i, 0)),
            pl.BlockSpec((KDIM, MSG_DIM), lambda i: (0, 0)),
            pl.BlockSpec((1, MSG_DIM), lambda i: (0, 0)),
        ],
        out_specs=pl.BlockSpec((te1, MSG_DIM), lambda i: (i, 0)),
        compiler_params=cparams,
        cost_estimate=pl.CostEstimate(
            flops=2 * e_pad1 * KDIM * MSG_DIM,
            transcendentals=0,
            bytes_accessed=e_pad1 * KDIM * 2 + e_pad1 * MSG_DIM * 2
            + KDIM * MSG_DIM * 2),
    )(msg_in, w_msg, b_msg)

    # ----- mean aggregation over incoming edges (wrapper glue, f32 accum) ----
    msgs_f32 = msgs[:e].astype(f32)
    agg_sum = jax.ops.segment_sum(msgs_f32, dst, num_segments=n)
    deg = jax.ops.segment_sum(jnp.ones((e,), f32), dst, num_segments=n)
    agg = agg_sum / jnp.maximum(deg, 1.0)[:, None]                     # [N,32]

    # ----- stage 2: per-node MLP, transposed / lane-dense (grid over N) ------
    node_in_t = jnp.concatenate([x, memory, agg], axis=1).T            # [96,N]
    node_in_t = jnp.pad(node_in_t, ((0, 0), (0, n_pad - n))).astype(bf16)

    h_t = pl.pallas_call(
        node_mlp_kernel,
        out_shape=jax.ShapeDtypeStruct((EMB_DIM, n_pad), bf16),
        grid=(n_pad // tn,),
        in_specs=[
            pl.BlockSpec((KDIM, tn), lambda i: (0, i)),
            pl.BlockSpec((HID, KDIM), lambda i: (0, 0)),
            pl.BlockSpec((HID, 1), lambda i: (0, 0)),
            pl.BlockSpec((HID, HID), lambda i: (0, 0)),
            pl.BlockSpec((HID, 1), lambda i: (0, 0)),
            pl.BlockSpec((EMB_DIM, HID), lambda i: (0, 0)),
            pl.BlockSpec((EMB_DIM, 1), lambda i: (0, 0)),
        ],
        out_specs=pl.BlockSpec((EMB_DIM, tn), lambda i: (0, i)),
        compiler_params=cparams,
        cost_estimate=pl.CostEstimate(
            flops=2 * n_pad * (KDIM * HID + HID * HID + HID * EMB_DIM),
            transcendentals=0,
            bytes_accessed=n_pad * KDIM * 2 + n_pad * EMB_DIM * 2
            + (KDIM + 2 * HID) * HID * 2),
    )(node_in_t, w1_t, b1_c, w2_t, b2_c, w3_t, b3_c)

    # ----- stage 3: per-edge classifier (grid over E tiles, lane-dense) ------
    hs_t = jnp.pad(jnp.take(h_t, src, axis=1), ((0, 0), (0, e_pad3 - e)))
    hd_t = jnp.pad(jnp.take(h_t, dst, axis=1), ((0, 0), (0, e_pad3 - e)))

    out_row = pl.pallas_call(
        classifier_kernel,
        out_shape=jax.ShapeDtypeStruct((1, e_pad3), f32),
        grid=(e_pad3 // te3,),
        in_specs=[
            pl.BlockSpec((EMB_DIM, te3), lambda i: (0, i)),
            pl.BlockSpec((EMB_DIM, te3), lambda i: (0, i)),
            pl.BlockSpec((HID, EMB_DIM), lambda i: (0, 0)),
            pl.BlockSpec((HID, EMB_DIM), lambda i: (0, 0)),
            pl.BlockSpec((HID, 1), lambda i: (0, 0)),
            pl.BlockSpec((HID, 1), lambda i: (0, 0)),
            pl.BlockSpec(memory_space=pltpu.MemorySpace.SMEM),
        ],
        out_specs=pl.BlockSpec((1, te3), lambda i: (0, i)),
        compiler_params=cparams,
        cost_estimate=pl.CostEstimate(
            flops=4 * e_pad3 * EMB_DIM * HID + 3 * e_pad3 * HID,
            transcendentals=e_pad3,
            bytes_accessed=2 * e_pad3 * EMB_DIM * 2 + e_pad3 * 4
            + 2 * HID * EMB_DIM * 2),
    )(hs_t, hd_t, wc1a_t, wc1b_t, bc1_c, wc2_c, bc2_s)

    return out_row[0, :e][:, None]                                     # [E,1]


if __name__ == "__main__":
    key = jax.random.PRNGKey(0)
    kx, ke, ka, km, kp = jax.random.split(key, 5)

    N, E = 16, 32
    x = jax.random.normal(kx, (N, FEAT_DIM), jnp.float32)
    edge_index = jax.random.randint(ke, (2, E), 0, N, dtype=jnp.int32)
    edge_attr = jax.random.normal(ka, (E, MSG_DIM), jnp.float32)
    memory = jax.random.normal(km, (N, MEM_DIM), jnp.float32)
    y = jnp.zeros((E, 1), jnp.float32)

    params = init_params(kp)

    fwd = jax.jit(functools.partial(tgn_link_predictor, params=params))
    out = jax.block_until_ready(fwd(x, edge_index, edge_attr, y, memory))

    assert out.shape == (E, 1)
    assert bool(jnp.all((out >= 0.0) & (out <= 1.0)))

    ref = reference_forward(x, edge_index, edge_attr, memory, params)
    max_diff = float(jnp.max(jnp.abs(out - ref)))
    # Error vs. the f32 reference stems from bf16 casts of inputs/weights and
    # bf16 intermediate storage; tightened from 0.1 per review.
    assert max_diff < 0.05, f"mismatch vs f32 reference: {max_diff}"

    print("KERNEL_OK")
</pallas_src>

<mosaic_0001>
module attributes {stable_mosaic.version = 11 : i64} {
  func.func @edge_msg_kernel(%arg0: i32, %arg1: memref<16x96xbf16, #tpu.memory_space<vmem>>, %arg2: memref<96x32xbf16, #tpu.memory_space<vmem>>, %arg3: memref<1x32xf32, #tpu.memory_space<vmem>>, %arg4: memref<16x32xbf16, #tpu.memory_space<vmem>>) attributes {dimension_semantics = [#tpu.dimension_semantics<parallel>], iteration_bounds = array<i64: 2>, scalar_prefetch = 0 : i64, scratch_operands = 0 : i64, tpu.core_type = #tpu.core_type<tc>, window_params = [{transform_indices = @transform_0, window_bounds = array<i64: 16, 96>}, {pipeline_mode = #tpu.pipeline_mode<synchronous>, transform_indices = @transform_1, window_bounds = array<i64: 96, 32>}, {pipeline_mode = #tpu.pipeline_mode<synchronous>, transform_indices = @transform_2, window_bounds = array<i64: 1, 32>}, {transform_indices = @transform_3, window_bounds = array<i64: 16, 32>}]} {
    %c0 = arith.constant 0 : index
    %c0_0 = arith.constant 0 : index
    %0 = vector.load %arg1[%c0, %c0_0] : memref<16x96xbf16, #tpu.memory_space<vmem>>, vector<16x96xbf16>
    %c0_1 = arith.constant 0 : index
    %c0_2 = arith.constant 0 : index
    %1 = vector.load %arg2[%c0_1, %c0_2] : memref<96x32xbf16, #tpu.memory_space<vmem>>, vector<96x32xbf16>
    %cst = arith.constant dense<0.000000e+00> : vector<16x32xf32>
    %2 = tpu.matmul %0, %1, %cst {dimension_numbers = #tpu.dot_dimension_numbers<[1], [0], [0], [1], [0, 0, 1, 1], [], []>} : vector<16x96xbf16>, vector<96x32xbf16>, vector<16x32xf32> -> vector<16x32xf32>
    %c0_3 = arith.constant 0 : index
    %c0_4 = arith.constant 0 : index
    %3 = vector.load %arg3[%c0_3, %c0_4] : memref<1x32xf32, #tpu.memory_space<vmem>>, vector<1x32xf32>
    %4 = vector.broadcast %3 : vector<1x32xf32> to vector<16x32xf32>
    %5 = arith.addf %2, %4 : vector<16x32xf32>
    %cst_5 = arith.constant 0.000000e+00 : f32
    %6 = vector.broadcast %cst_5 : f32 to vector<16x32xf32>
    %7 = arith.maximumf %5, %6 : vector<16x32xf32>
    %8 = arith.truncf %7 : vector<16x32xf32> to vector<16x32xbf16>
    %c0_6 = arith.constant 0 : index
    %c0_7 = arith.constant 0 : index
    %9 = vector.load %arg4[%c0_6, %c0_7] : memref<16x32xbf16, #tpu.memory_space<vmem>>, vector<16x32xbf16>
    tpu.vector_store %arg4[%c0_6, %c0_7], %8 {strides = array<i32>} : memref<16x32xbf16, #tpu.memory_space<vmem>>, vector<16x32xbf16>,
    return
  }
  func.func @transform_0(%arg0: i32) -> (i32, i32) {
    %c0_i32 = arith.constant 0 : i32
    %c0_i32_0 = arith.constant 0 : i32
    return %arg0, %c0_i32 : i32, i32
  }
  func.func @transform_1(%arg0: i32) -> (i32, i32) {
    %c0_i32 = arith.constant 0 : i32
    %c0_i32_0 = arith.constant 0 : i32
    %c0_i32_1 = arith.constant 0 : i32
    return %c0_i32, %c0_i32_0 : i32, i32
  }
  func.func @transform_2(%arg0: i32) -> (i32, i32) {
    %c0_i32 = arith.constant 0 : i32
    %c0_i32_0 = arith.constant 0 : i32
    %c0_i32_1 = arith.constant 0 : i32
    return %c0_i32, %c0_i32_0 : i32, i32
  }
  func.func @transform_3(%arg0: i32) -> (i32, i32) {
    %c0_i32 = arith.constant 0 : i32
    %c0_i32_0 = arith.constant 0 : i32
    return %arg0, %c0_i32 : i32, i32
  }
}

module attributes {stable_mosaic.version = 11 : i64} {
  func.func @node_mlp_kernel(%arg0: i32, %arg1: memref<96x128xbf16, #tpu.memory_space<vmem>>, %arg2: memref<32x96xbf16, #tpu.memory_space<vmem>>, %arg3: memref<32x1xf32, #tpu.memory_space<vmem>>, %arg4: memref<32x32xbf16, #tpu.memory_space<vmem>>, %arg5: memref<32x1xf32, #tpu.memory_space<vmem>>, %arg6: memref<32x32xbf16, #tpu.memory_space<vmem>>, %arg7: memref<32x1xf32, #tpu.memory_space<vmem>>, %arg8: memref<32x128xbf16, #tpu.memory_space<vmem>>) attributes {dimension_semantics = [#tpu.dimension_semantics<parallel>], iteration_bounds = array<i64: 1>, scalar_prefetch = 0 : i64, scratch_operands = 0 : i64, tpu.core_type = #tpu.core_type<tc>, window_params = [{transform_indices = @transform_0, window_bounds = array<i64: 96, 128>}, {pipeline_mode = #tpu.pipeline_mode<synchronous>, transform_indices = @transform_1, window_bounds = array<i64: 32, 96>}, {pipeline_mode = #tpu.pipeline_mode<synchronous>, transform_indices = @transform_2, window_bounds = array<i64: 32, 1>}, {pipeline_mode = #tpu.pipeline_mode<synchronous>, transform_indices = @transform_3, window_bounds = array<i64: 32, 32>}, {pipeline_mode = #tpu.pipeline_mode<synchronous>, transform_indices = @transform_4, window_bounds = array<i64: 32, 1>}, {pipeline_mode = #tpu.pipeline_mode<synchronous>, transform_indices = @transform_5, window_bounds = array<i64: 32, 32>}, {pipeline_mode = #tpu.pipeline_mode<synchronous>, transform_indices = @transform_6, window_bounds = array<i64: 32, 1>}, {transform_indices = @transform_7, window_bounds = array<i64: 32, 128>}]} {
    %c0 = arith.constant 0 : index
    %c0_0 = arith.constant 0 : index
    %0 = vector.load %arg2[%c0, %c0_0] : memref<32x96xbf16, #tpu.memory_space<vmem>>, vector<32x96xbf16>
    %c0_1 = arith.constant 0 : index
    %c0_2 = arith.constant 0 : index
    %1 = vector.load %arg1[%c0_1, %c0_2] : memref<96x128xbf16, #tpu.memory_space<vmem>>, vector<96x128xbf16>
    %cst = arith.constant dense<0.000000e+00> : vector<32x128xf32>
    %2 = tpu.matmul %0, %1, %cst {dimension_numbers = #tpu.dot_dimension_numbers<[1], [0], [0], [1], [0, 0, 1, 1], [], []>} : vector<32x96xbf16>, vector<96x128xbf16>, vector<32x128xf32> -> vector<32x128xf32>
    %c0_3 = arith.constant 0 : index
    %c0_4 = arith.constant 0 : index
    %3 = vector.load %arg3[%c0_3, %c0_4] : memref<32x1xf32, #tpu.memory_space<vmem>>, vector<32x1xf32>
    %4 = vector.broadcast %3 : vector<32x1xf32> to vector<32x128xf32>
    %5 = arith.addf %2, %4 : vector<32x128xf32>
    %cst_5 = arith.constant 0.000000e+00 : f32
    %6 = vector.broadcast %cst_5 : f32 to vector<32x128xf32>
    %7 = arith.maximumf %5, %6 : vector<32x128xf32>
    %8 = arith.truncf %7 : vector<32x128xf32> to vector<32x128xbf16>
    %c0_6 = arith.constant 0 : index
    %c0_7 = arith.constant 0 : index
    %9 = vector.load %arg4[%c0_6, %c0_7] : memref<32x32xbf16, #tpu.memory_space<vmem>>, vector<32x32xbf16>
    %cst_8 = arith.constant dense<0.000000e+00> : vector<32x128xf32>
    %10 = tpu.matmul %9, %8, %cst_8 {dimension_numbers = #tpu.dot_dimension_numbers<[1], [0], [0], [1], [0, 0, 1, 1], [], []>} : vector<32x32xbf16>, vector<32x128xbf16>, vector<32x128xf32> -> vector<32x128xf32>
    %c0_9 = arith.constant 0 : index
    %c0_10 = arith.constant 0 : index
    %11 = vector.load %arg5[%c0_9, %c0_10] : memref<32x1xf32, #tpu.memory_space<vmem>>, vector<32x1xf32>
    %12 = vector.broadcast %11 : vector<32x1xf32> to vector<32x128xf32>
    %13 = arith.addf %10, %12 : vector<32x128xf32>
    %cst_11 = arith.constant 0.000000e+00 : f32
    %14 = vector.broadcast %cst_11 : f32 to vector<32x128xf32>
    %15 = arith.maximumf %13, %14 : vector<32x128xf32>
    %16 = arith.truncf %15 : vector<32x128xf32> to vector<32x128xbf16>
    %c0_12 = arith.constant 0 : index
    %c0_13 = arith.constant 0 : index
    %17 = vector.load %arg6[%c0_12, %c0_13] : memref<32x32xbf16, #tpu.memory_space<vmem>>, vector<32x32xbf16>
    %cst_14 = arith.constant dense<0.000000e+00> : vector<32x128xf32>
    %18 = tpu.matmul %17, %16, %cst_14 {dimension_numbers = #tpu.dot_dimension_numbers<[1], [0], [0], [1], [0, 0, 1, 1], [], []>} : vector<32x32xbf16>, vector<32x128xbf16>, vector<32x128xf32> -> vector<32x128xf32>
    %c0_15 = arith.constant 0 : index
    %c0_16 = arith.constant 0 : index
    %19 = vector.load %arg7[%c0_15, %c0_16] : memref<32x1xf32, #tpu.memory_space<vmem>>, vector<32x1xf32>
    %20 = vector.broadcast %19 : vector<32x1xf32> to vector<32x128xf32>
    %21 = arith.addf %18, %20 : vector<32x128xf32>
    %22 = arith.truncf %21 : vector<32x128xf32> to vector<32x128xbf16>
    %c0_17 = arith.constant 0 : index
    %c0_18 = arith.constant 0 : index
    %23 = vector.load %arg8[%c0_17, %c0_18] : memref<32x128xbf16, #tpu.memory_space<vmem>>, vector<32x128xbf16>
    tpu.vector_store %arg8[%c0_17, %c0_18], %22 {strides = array<i32>} : memref<32x128xbf16, #tpu.memory_space<vmem>>, vector<32x128xbf16>,
    return
  }
  func.func @transform_0(%arg0: i32) -> (i32, i32) {
    %c0_i32 = arith.constant 0 : i32
    %c0_i32_0 = arith.constant 0 : i32
    return %c0_i32, %arg0 : i32, i32
  }
  func.func @transform_1(%arg0: i32) -> (i32, i32) {
    %c0_i32 = arith.constant 0 : i32
    %c0_i32_0 = arith.constant 0 : i32
    %c0_i32_1 = arith.constant 0 : i32
    return %c0_i32, %c0_i32_0 : i32, i32
  }
  func.func @transform_2(%arg0: i32) -> (i32, i32) {
    %c0_i32 = arith.constant 0 : i32
    %c0_i32_0 = arith.constant 0 : i32
    %c0_i32_1 = arith.constant 0 : i32
    return %c0_i32, %c0_i32_0 : i32, i32
  }
  func.func @transform_3(%arg0: i32) -> (i32, i32) {
    %c0_i32 = arith.constant 0 : i32
    %c0_i32_0 = arith.constant 0 : i32
    %c0_i32_1 = arith.constant 0 : i32
    return %c0_i32, %c0_i32_0 : i32, i32
  }
  func.func @transform_4(%arg0: i32) -> (i32, i32) {
    %c0_i32 = arith.constant 0 : i32
    %c0_i32_0 = arith.constant 0 : i32
    %c0_i32_1 = arith.constant 0 : i32
    return %c0_i32, %c0_i32_0 : i32, i32
  }
  func.func @transform_5(%arg0: i32) -> (i32, i32) {
    %c0_i32 = arith.constant 0 : i32
    %c0_i32_0 = arith.constant 0 : i32
    %c0_i32_1 = arith.constant 0 : i32
    return %c0_i32, %c0_i32_0 : i32, i32
  }
  func.func @transform_6(%arg0: i32) -> (i32, i32) {
    %c0_i32 = arith.constant 0 : i32
    %c0_i32_0 = arith.constant 0 : i32
    %c0_i32_1 = arith.constant 0 : i32
    return %c0_i32, %c0_i32_0 : i32, i32
  }
  func.func @transform_7(%arg0: i32) -> (i32, i32) {
    %c0_i32 = arith.constant 0 : i32
    %c0_i32_0 = arith.constant 0 : i32
    return %c0_i32, %arg0 : i32, i32
  }
}

module attributes {stable_mosaic.version = 11 : i64} {
  func.func @classifier_kernel(%arg0: i32, %arg1: memref<32x128xbf16, #tpu.memory_space<vmem>>, %arg2: memref<32x128xbf16, #tpu.memory_space<vmem>>, %arg3: memref<32x32xbf16, #tpu.memory_space<vmem>>, %arg4: memref<32x32xbf16, #tpu.memory_space<vmem>>, %arg5: memref<32x1xf32, #tpu.memory_space<vmem>>, %arg6: memref<32x1xf32, #tpu.memory_space<vmem>>, %arg7: memref<1xf32, #tpu.memory_space<smem>>, %arg8: memref<1x128xf32, #tpu.memory_space<vmem>>) attributes {dimension_semantics = [#tpu.dimension_semantics<parallel>], iteration_bounds = array<i64: 1>, scalar_prefetch = 0 : i64, scratch_operands = 0 : i64, tpu.core_type = #tpu.core_type<tc>, window_params = [{transform_indices = @transform_0, window_bounds = array<i64: 32, 128>}, {transform_indices = @transform_1, window_bounds = array<i64: 32, 128>}, {pipeline_mode = #tpu.pipeline_mode<synchronous>, transform_indices = @transform_2, window_bounds = array<i64: 32, 32>}, {pipeline_mode = #tpu.pipeline_mode<synchronous>, transform_indices = @transform_3, window_bounds = array<i64: 32, 32>}, {pipeline_mode = #tpu.pipeline_mode<synchronous>, transform_indices = @transform_4, window_bounds = array<i64: 32, 1>}, {pipeline_mode = #tpu.pipeline_mode<synchronous>, transform_indices = @transform_5, window_bounds = array<i64: 32, 1>}, {transform_indices = @transform_6, window_bounds = array<i64: 1>}, {transform_indices = @transform_7, window_bounds = array<i64: 1, 128>}]} {
    %c0 = arith.constant 0 : index
    %c0_0 = arith.constant 0 : index
    %0 = vector.load %arg3[%c0, %c0_0] : memref<32x32xbf16, #tpu.memory_space<vmem>>, vector<32x32xbf16>
    %c0_1 = arith.constant 0 : index
    %c0_2 = arith.constant 0 : index
    %1 = vector.load %arg1[%c0_1, %c0_2] : memref<32x128xbf16, #tpu.memory_space<vmem>>, vector<32x128xbf16>
    %cst = arith.constant dense<0.000000e+00> : vector<32x128xf32>
    %2 = tpu.matmul %0, %1, %cst {dimension_numbers = #tpu.dot_dimension_numbers<[1], [0], [0], [1], [0, 0, 1, 1], [], []>} : vector<32x32xbf16>, vector<32x128xbf16>, vector<32x128xf32> -> vector<32x128xf32>
    %c0_3 = arith.constant 0 : index
    %c0_4 = arith.constant 0 : index
    %3 = vector.load %arg4[%c0_3, %c0_4] : memref<32x32xbf16, #tpu.memory_space<vmem>>, vector<32x32xbf16>
    %c0_5 = arith.constant 0 : index
    %c0_6 = arith.constant 0 : index
    %4 = vector.load %arg2[%c0_5, %c0_6] : memref<32x128xbf16, #tpu.memory_space<vmem>>, vector<32x128xbf16>
    %cst_7 = arith.constant dense<0.000000e+00> : vector<32x128xf32>
    %5 = tpu.matmul %3, %4, %cst_7 {dimension_numbers = #tpu.dot_dimension_numbers<[1], [0], [0], [1], [0, 0, 1, 1], [], []>} : vector<32x32xbf16>, vector<32x128xbf16>, vector<32x128xf32> -> vector<32x128xf32>
    %6 = arith.addf %2, %5 : vector<32x128xf32>
    %c0_8 = arith.constant 0 : index
    %c0_9 = arith.constant 0 : index
    %7 = vector.load %arg5[%c0_8, %c0_9] : memref<32x1xf32, #tpu.memory_space<vmem>>, vector<32x1xf32>
    %8 = vector.broadcast %7 : vector<32x1xf32> to vector<32x128xf32>
    %9 = arith.addf %6, %8 : vector<32x128xf32>
    %cst_10 = arith.constant 0.000000e+00 : f32
    %10 = vector.broadcast %cst_10 : f32 to vector<32x128xf32>
    %11 = arith.maximumf %9, %10 : vector<32x128xf32>
    %c0_11 = arith.constant 0 : index
    %c0_12 = arith.constant 0 : index
    %12 = vector.load %arg6[%c0_11, %c0_12] : memref<32x1xf32, #tpu.memory_space<vmem>>, vector<32x1xf32>
    %13 = vector.broadcast %12 : vector<32x1xf32> to vector<32x128xf32>
    %14 = arith.mulf %11, %13 : vector<32x128xf32>
    %cst_13 = arith.constant dense<0.000000e+00> : vector<128xf32>
    %15 = vector.multi_reduction <add>, %14, %cst_13 [0] : vector<32x128xf32> to vector<128xf32>
    %16 = vector.shape_cast %15 : vector<128xf32> to vector<1x128xf32>
    %c0_14 = arith.constant 0 : index
    %17 = memref.load %arg7[%c0_14] : memref<1xf32, #tpu.memory_space<smem>>
    %18 = vector.broadcast %17 : f32 to vector<1x128xf32>
    %19 = arith.addf %16, %18 : vector<1x128xf32>
    %20 = arith.negf %19 : vector<1x128xf32>
    %21 = math.exp %20 : vector<1x128xf32>
    %cst_15 = arith.constant 1.000000e+00 : f32
    %22 = vector.broadcast %cst_15 : f32 to vector<1x128xf32>
    %23 = arith.addf %22, %21 : vector<1x128xf32>
    %24 = arith.divf %22, %23 : vector<1x128xf32>
    %c0_16 = arith.constant 0 : index
    %c0_17 = arith.constant 0 : index
    %25 = vector.load %arg8[%c0_16, %c0_17] : memref<1x128xf32, #tpu.memory_space<vmem>>, vector<1x128xf32>
    tpu.vector_store %arg8[%c0_16, %c0_17], %24 {strides = array<i32>} : memref<1x128xf32, #tpu.memory_space<vmem>>, vector<1x128xf32>,
    return
  }
  func.func @transform_0(%arg0: i32) -> (i32, i32) {
    %c0_i32 = arith.constant 0 : i32
    %c0_i32_0 = arith.constant 0 : i32
    return %c0_i32, %arg0 : i32, i32
  }
  func.func @transform_1(%arg0: i32) -> (i32, i32) {
    %c0_i32 = arith.constant 0 : i32
    %c0_i32_0 = arith.constant 0 : i32
    return %c0_i32, %arg0 : i32, i32
  }
  func.func @transform_2(%arg0: i32) -> (i32, i32) {
    %c0_i32 = arith.constant 0 : i32
    %c0_i32_0 = arith.constant 0 : i32
    %c0_i32_1 = arith.constant 0 : i32
    return %c0_i32, %c0_i32_0 : i32, i32
  }
  func.func @transform_3(%arg0: i32) -> (i32, i32) {
    %c0_i32 = arith.constant 0 : i32
    %c0_i32_0 = arith.constant 0 : i32
    %c0_i32_1 = arith.constant 0 : i32
    return %c0_i32, %c0_i32_0 : i32, i32
  }
  func.func @transform_4(%arg0: i32) -> (i32, i32) {
    %c0_i32 = arith.constant 0 : i32
    %c0_i32_0 = arith.constant 0 : i32
    %c0_i32_1 = arith.constant 0 : i32
    return %c0_i32, %c0_i32_0 : i32, i32
  }
  func.func @transform_5(%arg0: i32) -> (i32, i32) {
    %c0_i32 = arith.constant 0 : i32
    %c0_i32_0 = arith.constant 0 : i32
    %c0_i32_1 = arith.constant 0 : i32
    return %c0_i32, %c0_i32_0 : i32, i32
  }
  func.func @transform_6(%arg0: i32) -> i32 {
    %c0_i32 = arith.constant 0 : i32
    %c0_i32_0 = arith.constant 0 : i32
    return %c0_i32 : i32
  }
  func.func @transform_7(%arg0: i32) -> (i32, i32) {
    %c0_i32 = arith.constant 0 : i32
    %c0_i32_0 = arith.constant 0 : i32
    return %c0_i32, %arg0 : i32, i32
  }
}

</mosaic_0001>

<bundles_post_ra>
// kernel: tgn_link_predictor.3
= control target key start
LH: loop header
LB: loop body
LE: loop exit
PB: predicated region body
PF: predicated region fallthrough
CT: control target
= control target key end

     0   :  { %s399_s12 = smov 0   ;;  %s437_s0 = inlined_call_operand.vmem [shape: bf16[32,96], index: 0, kind: input, shape index: {}]   ;;  %s438_s1 = inlined_call_operand.vmem [shape: bf16[96,32], index: 1, kind: input, shape index: {}]   ;;  %s439_s2 = inlined_call_operand.vmem [shape: f32[1,32], index: 2, kind: input, shape index: {}]   ;;  %s440_s3 = inlined_call_operand.vmem [shape: bf16[32,32], index: 3, kind: output, shape index: {}]  }
   0x1 LB: > { %s315_s13 = sadd.s32 4294967295, %s377_s12   ;;  %p319_p0 = scmp.ge.s32.totalorder %s377_s12, 1  ;;  %s377_s12 = sphi %s399_s12, %s13_s12  }
   0x2   : > { %p138_p1 = scmp.lt.s32.totalorder %s377_s12, 3 }
   0x4   : > { %p139_p2 = pnand %p319_p0, %p138_p1 }
   0x5   : > { %s320_s18 = sshll.u32 (!%p139_p2), %s315_s13, 1 }
   0x6   : > { %142 = sbr.rel (%p139_p2) target bundleno = 176 (0xb0), region = 32  ;;  %p163_p3 = scmp.lt.s32.totalorder (!%p139_p2), %s320_s18, 3 }
   0xb   : > { %v361_v0 = vld [vmem:[%s438_s1 + $0x28] sm:$0xff]  ;;  %v360_v1 = vld [vmem:[%s438_s1 + $0x20] sm:$0xff]  ;;  %v359_v2 = vld [vmem:[%s438_s1 + $0x18] sm:$0xff]  ;;  %s442_s18 = smov (!%p163_p3, %s320_s18), 3  ;;  %vm234_vm0 = vcmask 785408   ;;  %vm256_vm1 = vcmask 257024  }
   0xc   : > { %240 = vmatpush.bf16.msra.mxu0 %v361_v0  ;;  %v358_v3 = vld [vmem:[%s438_s1 + $0x10] sm:$0xff]  ;;  %v357_v4 = vld [vmem:[%s438_s1 + $0x8] sm:$0xff]  ;;  %s321_s25 = sshll.u32 %s442_s18, 2  ;;  %v356_v5 = vld [vmem:[%s438_s1] sm:$0xff] }
   0xd   : > { %s166_s30 = scalar_lea.vmem %s437_s0, %s321_s25  ;;  %v370_v7 = vld [vmem:[%s439_s2] ss:$0 sm:$0xff]  ;;  %s172_s8 = scalar_lea.vmem %s440_s3, %s321_s25 }
   0xe   : > { %v355_v6 = vld [vmem:[%s166_s30] sm:$0xff] }
  0x10   : > { %241 = vmatpush.bf16.msra.mxu0 %v360_v1 }
  0x14   : > { %242 = vmatpush.bf16.msra.mxu0 %v359_v2 }
  0x18   : > { %243 = vmatpush.bf16.msra.mxu0 %v358_v3 }
  0x1c   : > { %244 = vmatpush.bf16.msra.mxu0 %v357_v4 }
  0x20   : > { %245 = vmatpush.bf16.msra.mxu0 %v356_v5 }
  0x23   : > { %352 = vmatmul.msk.bf16.vlgmr.msra.gmra.mxu0 %vm234_vm0, %v355_v6 }
  0xa0   : > { %v247_v8 = vpop.f32.mrf.mxu0 }
  0xa1   : > { %v248_v9 = vadd.f32 %v370_v7, %v247_v8 }
  0xa3   : > { %v252_v10 = vmax.f32 %v248_v9, 0.0 }
  0xa5   : > { %v254_v11 = vpack.c.bf16 %v252_v10, %v252_v10 }
  0xa7   : > { %257 = vst.msk [vmem:[%s172_s8] sm:$0xf] %vm256_vm1, %v254_v11 }
  0xa8   : > { %v249_v12 = vpop.f32.mrf.mxu0 }
  0xa9   : > { %v250_v13 = vadd.f32 %v370_v7, %v249_v12 }
  0xab   : > { %v253_v14 = vmax.f32 %v250_v13, 0.0 }
  0xad   : > { %v255_v15 = vpack.c.bf16 %v253_v14, %v253_v14 }
  0xaf   : > { %258 = vst.msk [vmem:[%s172_s8 + $0x4] sm:$0xf] %vm256_vm1, %v255_v15 }
  0xb0 PF: > { %s13_s12 = sadd.s32 1, %s377_s12  }
  0xb1   : > { %p10_p4 = scmp.ge.s32.totalorder %s13_s12, 4  }
  0xb3   :  { %12 = sbr.rel (!%p10_p4) target bundleno = 1 (0x1), region = 62 }

// kernel: tgn_link_predictor.4
= control target key start
LH: loop header
LB: loop body
LE: loop exit
PB: predicated region body
PF: predicated region fallthrough
CT: control target
= control target key end

     0   :  { %v377_v1 = vmov 0   ;;  %vm113_vm0 = vcmask 785408   ;;  %vm183_vm1 = vcmask 261120   ;;  %s500_s0 = inlined_call_operand.vmem [shape: bf16[96,128], index: 0, kind: input, shape index: {}]   ;;  %s501_s2 = inlined_call_operand.vmem [shape: f32[32,1], index: 2, kind: input, shape index: {}]   ;;  %s502_s4 = inlined_call_operand.vmem [shape: f32[32,1], index: 4, kind: input, shape index: {}]   ;;  %s503_s1 = inlined_call_operand.vmem [shape: bf16[32,96], index: 1, kind: input, shape index: {}]   ;;  %s504_s6 = inlined_call_operand.vmem [shape: f32[32,1], index: 6, kind: input, shape index: {}]   ;;  %s505_s3 = inlined_call_operand.vmem [shape: bf16[32,32], index: 3, kind: input, shape index: {}]   ;;  %s506_s5 = inlined_call_operand.vmem [shape: bf16[32,32], index: 5, kind: input, shape index: {}]   ;;  %s507_s7 = inlined_call_operand.vmem [shape: bf16[32,128], index: 7, kind: output, shape index: {}]  }
   0x1   :  { %v351_v0 = vld [vmem:[%s500_s0 + $0x28] sm:$0xff]  ;;  %374 = vset.pattern.permute.xlu0 %v377_v1  ;;  %375 = vset.pattern.permute.xlu1 %v377_v1  ;;  %v45_v2 = vld [vmem:[%s501_s2 + $0x10] sm:$0xff]  ;;  %v350_v3 = vld [vmem:[%s500_s0 + $0x20] sm:$0xff] }
   0x2   :  { %376 = vset.pattern.permute.xlu2 %v377_v1  ;;  %367 = vmatpush.bf16.msra.mxu3 %v351_v0  ;;  %v43_v4 = vld [vmem:[%s501_s2] sm:$0xff]  ;;  %v349_v5 = vld [vmem:[%s500_s0 + $0x18] sm:$0xff]  ;;  %v44_v7 = vld [vmem:[%s501_s2 + $0x8] sm:$0xff] }
   0x3   :  { %122 = vmatpush.bf16.msra.mxu0 %v351_v0  ;;  %59 = vperm.xlu0 %374, %v45_v2   ;;  %v46_v6 = vld [vmem:[%s501_s2 + $0x18] sm:$0xff]  ;;  %v348_v8 = vld [vmem:[%s500_s0 + $0x10] sm:$0xff]  ;;  %v347_v9 = vld [vmem:[%s500_s0 + $0x8] sm:$0xff] }
   0x4   :  { %49 = vperm.xlu1 %375, %v43_v4   ;;  %v149_v10 = vld [vmem:[%s502_s4] sm:$0xff]  ;;  %v150_v11 = vld [vmem:[%s502_s4 + $0x8] sm:$0xff]  ;;  %v221_v16 = vld [vmem:[%s504_s6 + $0x10] sm:$0xff] }
   0x5   :  { %v346_v12 = vld [vmem:[%s500_s0] sm:$0xff]  ;;  %v345_v13 = vld [vmem:[%s503_s1 + $0x8] sm:$0xff]  ;;  %v151_v22 = vld [vmem:[%s502_s4 + $0x10] sm:$0xff] }
   0x6   :  { %368 = vmatpush.bf16.msra.mxu3 %v350_v3  ;;  %v344_v14 = vld [vmem:[%s503_s1] sm:$0xff]  ;;  %v220_v15 = vld [vmem:[%s504_s6 + $0x8] sm:$0xff]  ;;  %165 = vperm.xlu2 %376, %v151_v22   ;;  %v152_v32 = vld [vmem:[%s502_s4 + $0x18] sm:$0xff] }
   0x7   :  { %123 = vmatpush.bf16.msra.mxu0 %v350_v3  ;;  %v352_v37 = vld [vmem:[%s505_s3] sm:$0xff]  ;;  %v222_v39 = vld [vmem:[%s504_s6 + $0x18] sm:$0xff]  ;;  %v353_v40 = vld [vmem:[%s505_s3 + $0x8] sm:$0xff] }
   0x8   :  { %v219_v38 = vld [vmem:[%s504_s6] sm:$0xff]  ;;  %v355_v60 = vld [vmem:[%s506_s5 + $0x8] sm:$0xff] }
   0x9   :  { %v354_v59 = vld [vmem:[%s506_s5] sm:$0xff] }
   0xa   :  { %369 = vmatpush.bf16.msra.mxu3 %v349_v5 }
   0xb   :  { %124 = vmatpush.bf16.msra.mxu0 %v349_v5  ;;  %64 = vperm.xlu0 %374, %v46_v6  }
   0xc   :  { %54 = vperm.xlu1 %375, %v44_v7  }
   0xe   :  { %370 = vmatpush.bf16.msra.mxu3 %v348_v8  ;;  %170 = vperm.xlu2 %376, %v152_v32  }
   0xf   :  { %125 = vmatpush.bf16.msra.mxu0 %v348_v8 }
  0x12   :  { %371 = vmatpush.bf16.msra.mxu3 %v347_v9 }
  0x13   :  { %126 = vmatpush.bf16.msra.mxu0 %v347_v9  ;;  %155 = vperm.xlu0 %374, %v149_v10  }
  0x14   :  { %160 = vperm.xlu1 %375, %v150_v11  }
  0x16   :  { %372 = vmatpush.bf16.msra.mxu3 %v346_v12  ;;  %225 = vperm.xlu2 %376, %v219_v38  }
  0x17   :  { %127 = vmatpush.bf16.msra.mxu0 %v346_v12 }
  0x19   :  { %323 = vmatmul.msk.bf16.vlgmr.msra.gmra.mxu3 %vm113_vm0, %v345_v13 }
  0x1a   :  { %322 = vmatmul.msk.bf16.vlgmr.msra.gmra.mxu0 %vm113_vm0, %v344_v14 }
  0x1b   :  { %230 = vperm.xlu0 %374, %v220_v15  }
  0x1c   :  { %235 = vperm.xlu1 %375, %v221_v16  }
  0x1e   :  { %240 = vperm.xlu2 %376, %v222_v39  }
  0x60   :  { %v166_v43 = vpop.permute.xlu2 %165 }
  0x68   :  { %v171_v47 = vpop.permute.xlu2 %170 }
  0x70   :  { %v226_v63 = vpop.permute.xlu2 %225 }
  0x75   :  { %v60_v18 = vpop.permute.xlu0 %59 }
  0x76   :  { %v50_v19 = vpop.permute.xlu1 %49 }
  0x78   :  { %v241_v6 = vpop.permute.xlu2 %240 }
  0x7d   :  { %v65_v23 = vpop.permute.xlu0 %64 }
  0x7e   :  { %v55_v25 = vpop.permute.xlu1 %54 }
  0x85   :  { %v156_v51 = vpop.permute.xlu0 %155 }
  0x86   :  { %v161_v45 = vpop.permute.xlu1 %160 }
  0x8d   :  { %v231_v62 = vpop.permute.xlu0 %230 }
  0x8e   :  { %v236_v5 = vpop.permute.xlu1 %235 }
  0x97   :  { %v129_v17 = vpop.f32.mrf.mxu0 }
  0x98   :  { %v130_v27 = vadd.f32 %v129_v17, %v50_v19 }
  0x9a   :  { %v139_v33 = vmax.f32 %v130_v27, 0.0 }
  0x9c   :  { %v134_v20 = vpop.f32.mrf.mxu3 }
  0x9d   :  { %v135_v24 = vadd.f32 %v134_v20, %v60_v18 }
  0x9f   :  { %v131_v21 = vpop.f32.mrf.mxu0  ;;  %v141_v30 = vmax.f32 %v135_v24, 0.0 }
  0xa0   :  { %v132_v28 = vadd.f32 %v131_v21, %v55_v25 }
  0xa2   :  { %v140_v34 = vmax.f32 %v132_v28, 0.0 }
  0xa4   :  { %v136_v26 = vpop.f32.mrf.mxu3  ;;  %v143_v36 = vpack.c.bf16 %v140_v34, %v139_v33 }
  0xa5   :  { %v137_v29 = vadd.f32 %v136_v26, %v65_v23 }
  0xa7   :  { %v142_v31 = vmax.f32 %v137_v29, 0.0 }
  0xa9   :  { %v144_v35 = vpack.c.bf16 %v142_v31, %v141_v30 }
  0xab   :  { %196 = vmatpush.bf16.msra.mxu1 %v144_v35 }
  0xaf   :  { %197 = vmatpush.bf16.msra.mxu1 %v143_v36 }
  0xb2   :  { %332 = vmatmul.msk.bf16.vlgmr.msra.gmra.mxu1 %vm183_vm1, %v352_v37 }
  0xc2   :  { %333 = vmatmul.msk.bf16.gmra.mxu1 %vm183_vm1, %v353_v40 }
 0x12f   :  { %v199_v41 = vpop.f32.mrf.mxu1 }
 0x130   :  { %v200_v52 = vadd.f32 %v199_v41, %v156_v51 }
 0x132   :  { %v209_v57 = vmax.f32 %v200_v52, 0.0 }
 0x137   :  { %v201_v42 = vpop.f32.mrf.mxu1 }
 0x138   :  { %v202_v49 = vadd.f32 %v201_v42, %v161_v45 }
 0x13a   :  { %v210_v55 = vmax.f32 %v202_v49, 0.0 }
 0x13c   :  { %v213_v58 = vpack.c.bf16 %v210_v55, %v209_v57 }
 0x13f   :  { %v204_v44 = vpop.f32.mrf.mxu1 }
 0x140   :  { %v205_v46 = vadd.f32 %v204_v44, %v166_v43 }
 0x142   :  { %v211_v53 = vmax.f32 %v205_v46, 0.0 }
 0x147   :  { %v206_v48 = vpop.f32.mrf.mxu1 }
 0x148   :  { %v207_v50 = vadd.f32 %v206_v48, %v171_v47 }
 0x14a   :  { %v212_v54 = vmax.f32 %v207_v50, 0.0 }
 0x14c   :  { %v214_v56 = vpack.c.bf16 %v212_v54, %v211_v53 }
 0x14e   :  { %265 = vmatpush.bf16.msra.mxu2 %v214_v56 }
 0x152   :  { %266 = vmatpush.bf16.msra.mxu2 %v213_v58 }
 0x155   :  { %342 = vmatmul.msk.bf16.vlgmr.msra.gmra.mxu2 %vm183_vm1, %v354_v59 }
 0x165   :  { %343 = vmatmul.msk.bf16.gmra.mxu2 %vm183_vm1, %v355_v60 }
 0x1d8   :  { %v268_v61 = vpop.f32.mrf.mxu2 }
 0x1d9   :  { %v269_v1 = vadd.f32 %v268_v61, %v226_v63 }
 0x1e0   :  { %v270_v0 = vpop.f32.mrf.mxu2 }
 0x1e1   :  { %v271_v2 = vadd.f32 %v270_v0, %v231_v62 }
 0x1e3   :  { %v359_v3 = vpack.c.bf16 %v271_v2, %v269_v1 }
 0x1e5   :  { %360 = vst [vmem:[%s507_s7] sm:$0xff] %v359_v3  }
 0x1e8   :  { %v273_v4 = vpop.f32.mrf.mxu2 }
 0x1e9   :  { %v274_v8 = vadd.f32 %v273_v4, %v236_v5 }
 0x1f0   :  { %v275_v7 = vpop.f32.mrf.mxu2 }
 0x1f1   :  { %v276_v9 = vadd.f32 %v275_v7, %v241_v6 }
 0x1f3   :  { %v364_v10 = vpack.c.bf16 %v276_v9, %v274_v8 }
 0x1f5   :  { %366 = vst [vmem:[%s507_s7 + $0x8] sm:$0xff] %v364_v10  }

// kernel: tgn_link_predictor.5
= control target key start
LH: loop header
LB: loop body
LE: loop exit
PB: predicated region body
PF: predicated region fallthrough
CT: control target
= control target key end

     0   :  { %v292_v2 = vmov 0   ;;  %vm66_vm0 = vcmask 261120   ;;  %s387_s1 = inlined_call_operand.vmem [shape: bf16[32,128], index: 1, kind: input, shape index: {}]   ;;  %s388_s0 = inlined_call_operand.vmem [shape: bf16[32,128], index: 0, kind: input, shape index: {}]   ;;  %s389_s4 = inlined_call_operand.vmem [shape: f32[32,1], index: 4, kind: input, shape index: {}]   ;;  %s390_s3 = inlined_call_operand.vmem [shape: bf16[32,32], index: 3, kind: input, shape index: {}]   ;;  %s391_s2 = inlined_call_operand.vmem [shape: bf16[32,32], index: 2, kind: input, shape index: {}]   ;;  %s392_s5 = inlined_call_operand.vmem [shape: f32[32,1], index: 5, kind: input, shape index: {}]   ;;  %s393_s6 = inlined_call_operand.<no memory space> [shape: f32[1], index: 6, kind: input, shape index: {}]   ;;  %s394_s7 = inlined_call_operand.vmem [shape: f32[1,128], index: 7, kind: output, shape index: {}]  }
   0x1   :  { %v279_v0 = vld [vmem:[%s387_s1 + $0x8] sm:$0xff]  ;;  %285 = vset.pattern.permute.xlu0 %v292_v2  ;;  %v139_v3 = vld [vmem:[%s389_s4] sm:$0xff]  ;;  %286 = vset.pattern.permute.xlu1 %v292_v2  ;;  %v141_v4 = vld [vmem:[%s389_s4 + $0x10] sm:$0xff]  ;;  %v209_v57 = vstv %s393_s6 }
   0x2   :  { %v275_v1 = vld [vmem:[%s388_s0 + $0x8] sm:$0xff]  ;;  %145 = vperm.xlu0 %285, %v139_v3   ;;  %287 = vset.pattern.permute.xlu2 %v292_v2  ;;  %v278_v5 = vld [vmem:[%s387_s1] sm:$0xff]  ;;  %v142_v13 = vld [vmem:[%s389_s4 + $0x18] sm:$0xff] }
   0x3   :  { %79 = vmatpush.bf16.msra.mxu0 %v279_v0  ;;  %280 = vmatpush.bf16.msra.mxu2 %v279_v0  ;;  %v274_v6 = vld [vmem:[%s388_s0] sm:$0xff]  ;;  %v277_v9 = vld [vmem:[%s390_s3 + $0x8] sm:$0xff]  ;;  %v173_v15 = vld [vmem:[%s392_s5 + $0x10] sm:$0xff] }
   0x4   :  { %126 = vmatpush.bf16.msra.mxu1 %v275_v1  ;;  %282 = vmatpush.bf16.msra.mxu3 %v275_v1  ;;  %v171_v7 = vld [vmem:[%s392_s5] sm:$0xff]  ;;  %v273_v11 = vld [vmem:[%s391_s2 + $0x8] sm:$0xff]  ;;  %v174_v16 = vld [vmem:[%s392_s5 + $0x18] sm:$0xff] }
   0x5   :  { %155 = vperm.xlu1 %286, %v141_v4   ;;  %v276_v8 = vld [vmem:[%s390_s3] sm:$0xff]  ;;  %177 = vperm.xlu2 %287, %v171_v7   ;;  %v140_v12 = vld [vmem:[%s389_s4 + $0x8] sm:$0xff] }
   0x6   :  { %v272_v10 = vld [vmem:[%s391_s2] sm:$0xff]  ;;  %v172_v14 = vld [vmem:[%s392_s5 + $0x8] sm:$0xff] }
   0x7   :  { %80 = vmatpush.bf16.msra.mxu0 %v278_v5  ;;  %281 = vmatpush.bf16.msra.mxu2 %v278_v5 }
   0x8   :  { %127 = vmatpush.bf16.msra.mxu1 %v274_v6  ;;  %283 = vmatpush.bf16.msra.mxu3 %v274_v6 }
   0xa   :  { %251 = vmatmul.msk.bf16.vlgmr.msra.gmra.mxu0 %vm66_vm0, %v276_v8  ;;  %252 = vmatmul.msk.bf16.vlgmr.msra.gmra.mxu2 %vm66_vm0, %v277_v9 }
   0xb   :  { %269 = vmatmul.msk.bf16.vlgmr.msra.gmra.mxu1 %vm66_vm0, %v272_v10  ;;  %270 = vmatmul.msk.bf16.vlgmr.msra.gmra.mxu3 %vm66_vm0, %v273_v11 }
   0xc   :  { %150 = vperm.xlu0 %285, %v140_v12  }
   0xd   :  { %160 = vperm.xlu1 %286, %v142_v13   ;;  %182 = vperm.xlu2 %287, %v172_v14  }
  0x14   :  { %187 = vperm.xlu0 %285, %v173_v15  }
  0x15   :  { %192 = vperm.xlu1 %286, %v174_v16  }
  0x5f   :  { %v178_v22 = vpop.permute.xlu2 %177 }
  0x67   :  { %v183_v37 = vpop.permute.xlu2 %182 }
  0x74   :  { %v146_v17 = vpop.permute.xlu0 %145 }
  0x77   :  { %v156_v19 = vpop.permute.xlu1 %155 }
  0x7e   :  { %v151_v28 = vpop.permute.xlu0 %150 }
  0x7f   :  { %v161_v31 = vpop.permute.xlu1 %160 }
  0x86   :  { %v188_v45 = vpop.permute.xlu0 %187 }
  0x87   :  { %v82_v18 = vpop.f32.mrf.mxu0  ;;  %v193_v48 = vpop.permute.xlu1 %192 }
  0x88   :  { %v129_v20 = vpop.f32.mrf.mxu1 }
  0x89   :  { %v130_v21 = vadd.f32 %v129_v20, %v82_v18 }
  0x8b   :  { %v163_v25 = vadd.f32 %v146_v17, %v130_v21 }
  0x8d   :  { %v87_v23 = vpop.f32.mrf.mxu2  ;;  %v167_v32 = vmax.f32 %v163_v25, 0.0 }
  0x8e   :  { %v134_v24 = vpop.f32.mrf.mxu3 }
  0x8f   :  { %v135_v26 = vadd.f32 %v134_v24, %v87_v23  ;;  %v84_v27 = vpop.f32.mrf.mxu0  ;;  %v195_v39 = vmul.f32 %v178_v22, %v167_v32 }
  0x90   :  { %v131_v29 = vpop.f32.mrf.mxu1 }
  0x91   :  { %v132_v30 = vadd.f32 %v131_v29, %v84_v27  ;;  %v165_v33 = vadd.f32 %v156_v19, %v135_v26 }
  0x93   :  { %v164_v34 = vadd.f32 %v151_v28, %v132_v30  ;;  %v169_v40 = vmax.f32 %v165_v33, 0.0 }
  0x95   :  { %v168_v35 = vmax.f32 %v164_v34, 0.0  ;;  %v89_v36 = vpop.f32.mrf.mxu2  ;;  %v197_v46 = vmul.f32 %v188_v45, %v169_v40 }
  0x96   :  { %v136_v38 = vpop.f32.mrf.mxu3 }
  0x97   :  { %v196_v41 = vmul.f32 %v183_v37, %v168_v35  ;;  %v137_v42 = vadd.f32 %v136_v38, %v89_v36 }
  0x99   :  { %v199_v43 = vadd.f32 %v196_v41, %v195_v39  ;;  %v166_v44 = vadd.f32 %v161_v31, %v137_v42 }
  0x9b   :  { %v170_v47 = vmax.f32 %v166_v44, 0.0  ;;  %v200_v50 = vadd.f32 %v199_v43, %v197_v46 }
  0x9d   :  { %v198_v49 = vmul.f32 %v193_v48, %v170_v47 }
  0x9f   :  { %v201_v51 = vadd.f32 %v200_v50, %v198_v49 }
  0xa1   :  { %v202_v52 = vrot.slane %v201_v51, 4 }
  0xa3   :  { %v203_v53 = vadd.f32 %v202_v52, %v201_v51 }
  0xa5   :  { %v204_v54 = vrot.slane %v203_v53, 2 }
  0xa7   :  { %v205_v55 = vadd.f32 %v204_v54, %v203_v53 }
  0xa9   :  { %v206_v56 = vrot.slane %v205_v55, 1 }
  0xab   :  { %v207_v58 = vadd.f32 %v206_v56, %v205_v55 }
  0xad   :  { %v210_v59 = vadd.f32 %v209_v57, %v207_v58 }
  0xaf   :  { %v271_v60 = vmul.f32 -1.442695, %v210_v59 }
  0xb1   :  { %288 = vpow2.f32 %v271_v60 }
  0xb7   :  { %v289_v61 = vpop.eup %288 }
  0xb8   :  { %v214_v62 = vadd.f32 1.0, %v289_v61 }
  0xba   :  { %290 = vrcp.f32 %v214_v62  ;;  %v226_v2 = vand.u32 2147483648, %v214_v62  ;;  %v224_v4 = vand.u32 2147483647, %v214_v62  ;;  %vm220_vm2 = vweird.f32 %v214_v62 }
  0xbc   :  { %v227_v6 = vor.u32 1.1754944e-38, %v226_v2  ;;  %vm225_vm4 = vcmp.eq.f32.partialorder %v224_v4, 8.507059e+37 }
  0xc0   :  { %v291_v63 = vpop.eup %290 }
  0xc1   :  { %v216_v0 = vmul.f32 %v291_v63, %v214_v62  ;;  %vm221_vm1 = vweird.f32 %v291_v63 }
  0xc2   :  { %vm222_vm3 = vmor %vm220_vm2, %vm221_vm1 }
  0xc3   :  { %v217_v1 = vsub.f32 1.0, %v216_v0 }
  0xc5   :  { %v218_v3 = vmul.f32 %v291_v63, %v217_v1 }
  0xc7   :  { %v219_v5 = vadd.f32 %v291_v63, %v218_v3 }
  0xc9   :  { %v223_v7 = vsel %vm222_vm3, %v291_v63, %v219_v5 }
  0xca   :  { %v228_v8 = vsel %vm225_vm4, %v227_v6, %v223_v7 }
  0xcb   :  { %230 = vst [vmem:[%s394_s7] sm:$0x1] %v228_v8 }

</bundles_post_ra>
